<compile_context>
chip_gen: v5e
topology: v5e:2x2
jax: 0.10.0
libtpu: 0.0.40
codegen_flags: <defaults>
</compile_context>

<pallas_src>
import jax
import jax.numpy as jnp
import numpy as np
from jax.experimental import pallas as pl
from jax.experimental.pallas import tpu as pltpu


def _fixed_pos_embedding(head_dim, base, seq_len):
    """Matches ROPE.fixed_pos_embedding: sin, cos of shape [seq_len, head_dim//2]."""
    inv_freq = 1.0 / (base ** (jnp.arange(0, head_dim, 2, dtype=jnp.float32) / head_dim))
    pos = jnp.arange(0, seq_len, dtype=jnp.float32)
    sinusoid_inp = jnp.einsum("i,j->ij", pos, inv_freq)
    return jnp.sin(sinusoid_inp), jnp.cos(sinusoid_inp)


def _duplicate_interleave(m):
    """[S, D/2] -> [S, D] with columns s0,s0,s1,s1,..."""
    return jnp.repeat(m, 2, axis=-1)


def _rope_kernel(x_ref, cos_ref, sin_even_ref, sin_odd_ref, o_ref):
    # x_ref/o_ref: (TR, TC); cos/sin_even/sin_odd: (1, TC), broadcast over rows.
    x = x_ref[...].astype(jnp.float32)
    n = x.shape[-1]
    # jnp.roll semantics: nxt[i] = x[i+1 mod n], prv[i] = x[i-1 mod n].
    nxt = pltpu.roll(x, shift=n - 1, axis=1)
    prv = pltpu.roll(x, shift=1, axis=1)
    # sin_even = -sin at even lanes / 0 at odd; sin_odd = sin at odd lanes / 0 at even,
    # so this reproduces rotate_every_two(x) * sin exactly (wrapped roll entries hit zeros).
    out = x * cos_ref[...] + nxt * sin_even_ref[...] + prv * sin_odd_ref[...]
    o_ref[...] = out.astype(o_ref.dtype)


def _pick_tile(total, align, max_tile):
    """Largest multiple of `align` that divides `total` and is <= max_tile.

    Falls back to `total` (full-extent block is always a legal BlockSpec dim)."""
    if total <= max_tile:
        return total
    t = (max_tile // align) * align
    while t >= align:
        if total % t == 0:
            return t
        t -= align
    return total


def rope_forward(x, cos_dup, sin_even, sin_odd, *, target_block_bytes=2 * 1024 * 1024):
    """x: [BH, S, D]; cos_dup/sin_even/sin_odd: [S, D] float32 tables."""
    bh, s, d = x.shape
    n = s * d
    # Lane-dense 2-D views (layout plumbing only, no compute in the wrapper).
    x2 = x.reshape(bh, n)
    cos_f = cos_dup.reshape(1, n)
    sin_e = sin_even.reshape(1, n)
    sin_o = sin_odd.reshape(1, n)

    itemsize = jnp.dtype(x.dtype).itemsize
    # Row tile: multiple of 8 sublanes (or full BH); column tile: multiple of 128
    # lanes (or full S*D), sized so each data block is ~2 MiB -> fits the default
    # scoped-VMEM budget on v5e/v6e/v7x with double-buffered in+out blocks.
    tr = _pick_tile(bh, 8, 256)
    tc_cap = max(128, target_block_bytes // (tr * itemsize))
    tc = _pick_tile(n, 128, tc_cap)

    grid = (bh // tr, n // tc)

    out2 = pl.pallas_call(
        _rope_kernel,
        out_shape=jax.ShapeDtypeStruct((bh, n), x.dtype),
        grid_spec=pltpu.PrefetchScalarGridSpec(
            num_scalar_prefetch=0,
            grid=grid,
            in_specs=[
                pl.BlockSpec((tr, tc), lambda i, j: (i, j)),
                pl.BlockSpec((1, tc), lambda i, j: (0, j)),
                pl.BlockSpec((1, tc), lambda i, j: (0, j)),
                pl.BlockSpec((1, tc), lambda i, j: (0, j)),
            ],
            out_specs=pl.BlockSpec((tr, tc), lambda i, j: (i, j)),
        ),
        compiler_params=pltpu.CompilerParams(
            dimension_semantics=("parallel", "parallel"),
        ),
    )(x2, cos_f, sin_e, sin_o)
    return out2.reshape(bh, s, d)


class RopePallas:
    """Mirror of the PyTorch ROPE module; forward implemented with the Pallas kernel."""

    def __init__(self, head_dim, base=10000, max_positions=512):
        self.base = base
        self.head_dim = head_dim
        self.sin, self.cos = _fixed_pos_embedding(head_dim, base, max_positions)

    def _tables(self, sin_half, cos_half):
        sin_dup = _duplicate_interleave(sin_half)   # [S, D]
        cos_dup = _duplicate_interleave(cos_half)   # [S, D]
        lane = jnp.arange(self.head_dim) % 2
        sin_even = jnp.where(lane == 0, -sin_dup, 0.0).astype(jnp.float32)
        sin_odd = jnp.where(lane == 1, sin_dup, 0.0).astype(jnp.float32)
        return cos_dup.astype(jnp.float32), sin_even, sin_odd

    def __call__(self, x):
        seq_len = x.shape[1]
        if seq_len > self.sin.shape[0]:
            # Mirrors the PyTorch buffer refresh when the sequence is longer.
            self.sin, self.cos = _fixed_pos_embedding(self.head_dim, self.base, seq_len)
        sin_half, cos_half = self.sin[:seq_len], self.cos[:seq_len]
        cos_dup, sin_even, sin_odd = self._tables(sin_half, cos_half)
        return rope_forward(x, cos_dup, sin_even, sin_odd)


def _reference(x, sin_half, cos_half):
    """Pure-numpy reference reproducing the PyTorch semantics exactly."""
    x = np.asarray(x)
    sin = np.repeat(np.asarray(sin_half), 2, axis=-1)
    cos = np.repeat(np.asarray(cos_half), 2, axis=-1)
    x1 = x[:, :, ::2]
    x2 = x[:, :, 1::2]
    rot = np.stack((-x2, x1), axis=-1).reshape(x.shape)
    return x * cos + rot * sin


if __name__ == "__main__":
    bsz, n_heads, seq_len, head_dim = 2, 4, 8, 32
    key = jax.random.PRNGKey(0)
    x = jax.random.normal(key, (bsz * n_heads, seq_len, head_dim), dtype=jnp.float32)

    rope = RopePallas(head_dim=head_dim, base=10000, max_positions=512)
    out = jax.block_until_ready(rope(x))

    ref = _reference(x, rope.sin[:seq_len], rope.cos[:seq_len])
    np.testing.assert_allclose(np.asarray(out), ref, rtol=1e-5, atol=1e-5)

    print("KERNEL_OK")
</pallas_src>

<mosaic_0001>
module attributes {stable_mosaic.version = 11 : i64} {
  func.func @_rope_kernel(%arg0: i32, %arg1: i32, %arg2: memref<8x256xf32, #tpu.memory_space<vmem>>, %arg3: memref<1x256xf32, #tpu.memory_space<vmem>>, %arg4: memref<1x256xf32, #tpu.memory_space<vmem>>, %arg5: memref<1x256xf32, #tpu.memory_space<vmem>>, %arg6: memref<8x256xf32, #tpu.memory_space<vmem>>) attributes {dimension_semantics = [#tpu.dimension_semantics<parallel>, #tpu.dimension_semantics<parallel>], iteration_bounds = array<i64: 1, 1>, scalar_prefetch = 0 : i64, scratch_operands = 0 : i64, tpu.core_type = #tpu.core_type<tc>, window_params = [{transform_indices = @transform_0, window_bounds = array<i64: 8, 256>}, {transform_indices = @transform_1, window_bounds = array<i64: 1, 256>}, {transform_indices = @transform_2, window_bounds = array<i64: 1, 256>}, {transform_indices = @transform_3, window_bounds = array<i64: 1, 256>}, {transform_indices = @transform_4, window_bounds = array<i64: 8, 256>}]} {
    %c0 = arith.constant 0 : index
    %c0_0 = arith.constant 0 : index
    %0 = vector.load %arg2[%c0, %c0_0] : memref<8x256xf32, #tpu.memory_space<vmem>>, vector<8x256xf32>
    %c255_i32 = arith.constant 255 : i32
    %1 = tpu.dynamic_rotate %0 by %c255_i32 dim 1 : vector<8x256xf32>, i32 -> vector<8x256xf32>
    %c1_i32 = arith.constant 1 : i32
    %2 = tpu.dynamic_rotate %0 by %c1_i32 dim 1 : vector<8x256xf32>, i32 -> vector<8x256xf32>
    %c0_1 = arith.constant 0 : index
    %c0_2 = arith.constant 0 : index
    %3 = vector.load %arg3[%c0_1, %c0_2] : memref<1x256xf32, #tpu.memory_space<vmem>>, vector<1x256xf32>
    %4 = vector.broadcast %3 : vector<1x256xf32> to vector<8x256xf32>
    %5 = arith.mulf %0, %4 : vector<8x256xf32>
    %c0_3 = arith.constant 0 : index
    %c0_4 = arith.constant 0 : index
    %6 = vector.load %arg4[%c0_3, %c0_4] : memref<1x256xf32, #tpu.memory_space<vmem>>, vector<1x256xf32>
    %7 = vector.broadcast %6 : vector<1x256xf32> to vector<8x256xf32>
    %8 = arith.mulf %1, %7 : vector<8x256xf32>
    %9 = arith.addf %5, %8 : vector<8x256xf32>
    %c0_5 = arith.constant 0 : index
    %c0_6 = arith.constant 0 : index
    %10 = vector.load %arg5[%c0_5, %c0_6] : memref<1x256xf32, #tpu.memory_space<vmem>>, vector<1x256xf32>
    %11 = vector.broadcast %10 : vector<1x256xf32> to vector<8x256xf32>
    %12 = arith.mulf %2, %11 : vector<8x256xf32>
    %13 = arith.addf %9, %12 : vector<8x256xf32>
    %c0_7 = arith.constant 0 : index
    %c0_8 = arith.constant 0 : index
    %14 = vector.load %arg6[%c0_7, %c0_8] : memref<8x256xf32, #tpu.memory_space<vmem>>, vector<8x256xf32>
    tpu.vector_store %arg6[%c0_7, %c0_8], %13 {strides = array<i32>} : memref<8x256xf32, #tpu.memory_space<vmem>>, vector<8x256xf32>,
    return
  }
  func.func @transform_0(%arg0: i32, %arg1: i32) -> (i32, i32) {
    %c0_i32 = arith.constant 0 : i32
    return %arg0, %arg1 : i32, i32
  }
  func.func @transform_1(%arg0: i32, %arg1: i32) -> (i32, i32) {
    %c0_i32 = arith.constant 0 : i32
    %c0_i32_0 = arith.constant 0 : i32
    return %c0_i32, %arg1 : i32, i32
  }
  func.func @transform_2(%arg0: i32, %arg1: i32) -> (i32, i32) {
    %c0_i32 = arith.constant 0 : i32
    %c0_i32_0 = arith.constant 0 : i32
    return %c0_i32, %arg1 : i32, i32
  }
  func.func @transform_3(%arg0: i32, %arg1: i32) -> (i32, i32) {
    %c0_i32 = arith.constant 0 : i32
    %c0_i32_0 = arith.constant 0 : i32
    return %c0_i32, %arg1 : i32, i32
  }
  func.func @transform_4(%arg0: i32, %arg1: i32) -> (i32, i32) {
    %c0_i32 = arith.constant 0 : i32
    return %arg0, %arg1 : i32, i32
  }
}

</mosaic_0001>

<bundles_post_ra>
// kernel: tpu_custom_call.1
= control target key start
LH: loop header
LB: loop body
LE: loop exit
PB: predicated region body
PF: predicated region fallthrough
CT: control target
= control target key end

     0   :  { %9 = vsyncpa [#allocation3], 0  ;;  %s279_s0 = inlined_call_operand.hbm [shape: f32[8,256], index: 0, kind: input, shape index: {}]   ;;  %s280_s1 = inlined_call_operand.hbm [shape: f32[1,256], index: 1, kind: input, shape index: {}]   ;;  %s281_s2 = inlined_call_operand.hbm [shape: f32[1,256], index: 2, kind: input, shape index: {}]   ;;  %s282_s3 = inlined_call_operand.vmem [shape: f32[1,256], index: 3, kind: input, shape index: {}]   ;;  %s283_s4 = inlined_call_operand.hbm [shape: f32[8,256], index: 4, kind: output, shape index: {}]  }
   0x1   :  { %10 = vsyncpa [#allocation6], 0  ;;  %s28_s17 = sshll.u32 %s280_s1, 4  ;;  %s29_s17 = int_to_ptr.hbm [resolvable:$true] %s28_s17 }
   0x2   :  { %11 = vsyncpa [#allocation4], 0  ;;  %s233_s18 = smov [#allocation5]   ;;  %s17_s22 = sshll.u32 %s279_s0, 4  ;;  %s18_s22 = int_to_ptr.hbm [resolvable:$true] %s17_s22 }
   0x3   :  { %s30_s19 = sshll.u32 %s233_s18, 4  ;;  %s234_s23 = smov [#allocation2]   ;;  %s31_s19 = int_to_ptr.vmem [resolvable:$true] %s30_s19 }
   0x4   :  { %33 = dma.hbm_to_vmem [thread:$0]  %s29_s17, 32, %s31_s19, [#allocation6]  }
   0x5   :  { %s19_s24 = sshll.u32 %s234_s23, 4  ;;  %s39_s27 = sshll.u32 %s281_s2, 4  ;;  %s20_s24 = int_to_ptr.vmem [resolvable:$true] %s19_s24  ;;  %s40_s27 = int_to_ptr.hbm [resolvable:$true] %s39_s27 }
   0x6   :  { %22 = dma.hbm_to_vmem [thread:$0]  %s18_s22, 256, %s20_s24, [#allocation3]  }
   0x7   :  { %s235_s1 = smov [#allocation7]  }
   0x8   :  { %s41_s28 = sshll.u32 %s235_s1, 4  ;;  %s42_s28 = int_to_ptr.vmem [resolvable:$true] %s41_s28 }
   0x9   :  { %44 = dma.hbm_to_vmem [thread:$0]  %s40_s27, 32, %s42_s28, [#allocation6]  }
   0xa   :  { %227 = dma.done.wait [#allocation3], 256  }
   0xb   :  { %228 = vsyncadd [#allocation3], 4294967040 }
   0xc   :  { %229 = dma.done.wait [#allocation6], 64  }
   0xd   :  { %230 = vsyncadd [#allocation6], 4294967232  ;;  %v59_v0 = vld [vmem:[#allocation2] sm:$0xff]  ;;  %s236_s0 = smov 1   ;;  %s237_s29 = smov 127   ;;  %v60_v1 = vld [vmem:[#allocation2 + $0x8] sm:$0xff]  ;;  %v65_v2 = vlaneseq }
   0xe   :  { %70 = vrot.lane.b32.xlu1 %v59_v0, %s236_s0  ;;  %61 = vrot.lane.b32.xlu0 %v59_v0, %s237_s29  ;;  %v77_v5 = vld [vmem:[#allocation5] sm:$0x3]  ;;  %v85_v7 = vld [vmem:[#allocation7] sm:$0x3]  ;;  %v95_v10 = vld [vmem:[%s282_s3] sm:$0x3] }
   0xf   :  { %v66_v6 = vand.u32 127, %v65_v2  ;;  %v79_v8 = vperm.slane %v77_v5, 0  ;;  %v80_v9 = vperm.slane %v77_v5, 1  ;;  %v87_v11 = vperm.slane %v85_v7, 0  ;;  %s238_s3 = smov [#allocation8]   ;;  %s114_s8 = sshll.u32 %s283_s4, 4  ;;  %s115_s8 = int_to_ptr.hbm [resolvable:$true] %s114_s8 }
  0x10   :  { %v88_v12 = vperm.slane %v85_v7, 1  ;;  %v97_v15 = vperm.slane %v95_v10, 0  ;;  %v98_v16 = vperm.slane %v95_v10, 1  ;;  %s112_s5 = sshll.u32 %s238_s3, 4  ;;  %s113_s5 = int_to_ptr.vmem [resolvable:$true] %s112_s5 }
  0x11   :  { %vm74_vm0 = vcmp.lt.s32.totalorder %v66_v6, 1  ;;  %vm67_vm1 = vcmp.lt.s32.totalorder %v66_v6, 127  ;;  %v83_v13 = vmul.f32 %v79_v8, %v59_v0  ;;  %v84_v14 = vmul.f32 %v80_v9, %v60_v1 }
  0x16   :  { %72 = vrot.lane.b32.xlu1 %v60_v1, %s236_s0  ;;  %63 = vrot.lane.b32.xlu0 %v60_v1, %s237_s29 }
  0x80   :  { %v71_v3 = vpop.permute.xlu1 %70  ;;  %v62_v4 = vpop.permute.xlu0 %61 }
  0x88   :  { %v73_v17 = vpop.permute.xlu1 %72  ;;  %v64_v18 = vpop.permute.xlu0 %63 }
  0x89   :  { %v75_v19 = vsel %vm74_vm0, %v71_v3, %v73_v17  ;;  %v76_v20 = vsel %vm74_vm0, %v73_v17, %v71_v3  ;;  %v68_v21 = vsel %vm67_vm1, %v62_v4, %v64_v18  ;;  %v69_v22 = vsel %vm67_vm1, %v64_v18, %v62_v4 }
  0x8a   :  { %v91_v23 = vmul.f32 %v87_v11, %v68_v21  ;;  %v92_v24 = vmul.f32 %v88_v12, %v69_v22  ;;  %v101_v25 = vmul.f32 %v97_v15, %v76_v20  ;;  %v102_v26 = vmul.f32 %v98_v16, %v75_v19 }
  0x8c   :  { %v93_v27 = vadd.f32 %v91_v23, %v83_v13  ;;  %v94_v28 = vadd.f32 %v92_v24, %v84_v14 }
  0x8e   :  { %v103_v29 = vadd.f32 %v101_v25, %v93_v27  ;;  %v104_v30 = vadd.f32 %v102_v26, %v94_v28 }
  0x90   :  { %105 = vst [vmem:[#allocation8] sm:$0xff] %v103_v29 }
  0x91   :  { %106 = vst [vmem:[#allocation8 + $0x8] sm:$0xff] %v104_v30 }
  0x92   :  { %117 = dma.vmem_to_hbm [thread:$0]  %s113_s5, 256, %s115_s8, [#allocation4]  }
  0x93   :  { %231 = dma.done.wait [#allocation4], 256  }
  0x94   :  { %232 = vsyncadd [#allocation4], 4294967040 }
  0x95   :  { %122 = vsyncpa [#allocation3], 1 }
  0x96   :  { %123 = vsyncpa [#allocation6], 1 }
  0x97   :  { %124 = vsyncpa [#allocation4], 1 }

</bundles_post_ra>
